<compile_context>
chip_gen: v7x
topology: tpu7x:2x2x1
jax: 0.10.0
libtpu: 0.0.40
codegen_flags: <defaults>
</compile_context>

<pallas_src>
import jax
import jax.numpy as jnp
from jax.experimental import pallas as pl
from jax.experimental.pallas import tpu as pltpu


_MAX_BLOCK_ROWS = 2048  # packed rows per grid step (= 4096 original samples)


def _gelu_exact(x):
    # PyTorch nn.GELU() default = exact erf formulation (used by the reference).
    return 0.5 * x * (1.0 + jax.lax.erf(x * (1.0 / jnp.sqrt(2.0)).astype(x.dtype)))


# --------------------------------------------------------------------------- #
# Kernel
# --------------------------------------------------------------------------- #
def adaptive_decision_kernel(x_ref, vec_ref, mmat_ref, wdg_ref, w1f_ref,
                             w2f_ref, out_ref):
    pd, p2d = w1f_ref.shape          # P*d, P*2d
    PC = out_ref.shape[-1]           # P*C (packed lane width, 128 when C=64)

    x = x_ref[...].astype(jnp.float32)
    residual = x

    vecs = vec_ref[...]              # (8, width) f32, packed per-channel rows
    gamma = vecs[0:1, :PC]
    beta = vecs[1:2, :PC]
    b2f = vecs[2:3, :PC]
    b1f = vecs[3:4, :p2d]

    mm = wdg_ref.dtype               # matmul operand dtype (bf16; f32 accumulate)

    # Per-sample LayerNorm stats via the block-diagonal averaging matmul.
    # mmat has 1/C in each sample's diagonal block, so x @ mmat broadcasts the
    # per-sample mean to that sample's lane group; same for E[x^2].
    mean_bc = jnp.dot(x.astype(mm), mmat_ref[...],
                      preferred_element_type=jnp.float32)
    ex2_bc = jnp.dot((x * x).astype(mm), mmat_ref[...],
                     preferred_element_type=jnp.float32)
    var_bc = jnp.maximum(ex2_bc - mean_bc * mean_bc, 0.0)
    xn = (x - mean_bc) * jax.lax.rsqrt(var_bc + 1e-5) * gamma + beta

    # Fused [down_proj | gate_proj] (block-diagonal over the packed samples):
    # one MXU push, then split + sigmoid gate (aligned 32-lane groups).
    hg = jnp.dot(xn.astype(mm), wdg_ref[...], preferred_element_type=jnp.float32)
    h0 = hg[:, :pd] * jax.nn.sigmoid(hg[:, pd:])

    # Fused [dw-centre-tap * BN1 * 1x1-conv * BN2 * FNN layer 1].
    f = jnp.dot(h0.astype(mm), w1f_ref[...], preferred_element_type=jnp.float32) + b1f
    # Deliberate tanh-approx GELU (EUP) instead of exact erf (VALU polynomial).
    f = jax.nn.gelu(f, approximate=True)

    # Fused [FNN layer 2 @ (V-proj @ out_proj) @ (up_proj + LoRA)] * 0.6.
    u = jnp.dot(f.astype(mm), w2f_ref[...], preferred_element_type=jnp.float32) + b2f

    out_ref[...] = (u + 0.4 * residual).astype(out_ref.dtype)


# --------------------------------------------------------------------------- #
# Wrapper
# --------------------------------------------------------------------------- #
def _num_tensorcores():
    """Best-effort TensorCores-per-chip detection (v7x has 2); safe fallback 1."""
    try:
        kind = jax.devices()[0].device_kind.lower()
    except Exception:
        return 1
    return 2 if "v7" in kind else 1


def _choose_block(bp, num_cores, cap=_MAX_BLOCK_ROWS):
    """Pick the packed-row block size (multiple of 8, <= cap)."""
    if num_cores >= 2:
        # v7x: keep several 'parallel' steps so both TCs get work + pipeline
        # slack, unless the batch is tiny (then overhead dominates).
        if bp >= 2048:
            min_steps = 4
        elif bp >= 256:
            min_steps = 2
        else:
            min_steps = 1
    else:
        # v5e / v6e: one TC -> a single grid step whenever it fits one tile.
        min_steps = 1
    nsteps = max(min_steps, -(-bp // cap))
    blk = -(-bp // nsteps)
    blk = ((blk + 7) // 8) * 8
    return max(8, min(blk, cap))


def adaptive_decision(x, fused, *, block_rows=None, num_cores=None):
    vec_pack, mmat, wdg_p, w1f_p, w2f_p = fused
    B, C = x.shape
    PC = mmat.shape[0]
    assert PC % C == 0 and wdg_p.shape[0] == PC and w2f_p.shape[1] == PC
    P = PC // C                                    # samples packed per row

    if num_cores is None:
        num_cores = _num_tensorcores()

    bp = -(-B // P)                                # packed rows needed
    if block_rows is None:
        block_rows = _choose_block(bp, num_cores)
    bp_pad = -(-bp // block_rows) * block_rows
    Bp = bp_pad * P
    if Bp != B:
        x = jnp.pad(x, ((0, Bp - B), (0, 0)))
    xpk = x.reshape(bp_pad, PC)                    # free reshape (row-major)

    out = pl.pallas_call(
        adaptive_decision_kernel,
        out_shape=jax.ShapeDtypeStruct((bp_pad, PC), x.dtype),
        grid_spec=pltpu.PrefetchScalarGridSpec(
            num_scalar_prefetch=0,
            grid=(bp_pad // block_rows,),
            in_specs=[
                pl.BlockSpec((block_rows, PC), lambda i: (i, 0)),
                pl.BlockSpec(vec_pack.shape, lambda i: (0, 0)),
                pl.BlockSpec(mmat.shape, lambda i: (0, 0)),
                pl.BlockSpec(wdg_p.shape, lambda i: (0, 0)),
                pl.BlockSpec(w1f_p.shape, lambda i: (0, 0)),
                pl.BlockSpec(w2f_p.shape, lambda i: (0, 0)),
            ],
            out_specs=pl.BlockSpec((block_rows, PC), lambda i: (i, 0)),
        ),
        compiler_params=pltpu.CompilerParams(dimension_semantics=("parallel",)),
    )(xpk, vec_pack, mmat, wdg_p, w1f_p, w2f_p)

    return out.reshape(Bp, C)[:B]


# --------------------------------------------------------------------------- #
# Parameters: synthetic init, offline fusion, pure-JAX reference
# --------------------------------------------------------------------------- #
def init_params(key, c_in=64, reduction=4, rank=16):
    """Deterministic synthetic parameters mirroring the PyTorch module shapes.

    Linear / 1x1-conv weights are generated directly in (in, out) layout with a
    PyTorch-style uniform(-1/sqrt(fan_in), 1/sqrt(fan_in)) range.
    """
    d = c_in // reduction
    ks = iter(jax.random.split(key, 20))

    def lin_w(fan_in, fan_out):
        bound = 1.0 / float(fan_in) ** 0.5
        return jax.random.uniform(next(ks), (fan_in, fan_out), jnp.float32, -bound, bound)

    def lin_b(fan_in, fan_out):
        bound = 1.0 / float(fan_in) ** 0.5
        return jax.random.uniform(next(ks), (1, fan_out), jnp.float32, -bound, bound)

    gamma = jnp.ones((1, c_in), jnp.float32)          # LayerNorm weight
    beta = jnp.zeros((1, c_in), jnp.float32)          # LayerNorm bias

    wdown = lin_w(c_in, d)                            # down_proj (no bias)
    wgate = lin_w(c_in, d)                            # gate_proj (no bias)

    # Depthwise Conv1d(k=3, groups=d, bias=False): only centre tap touches data.
    dw_bound = 1.0 / (3.0 ** 0.5)
    dw = jax.random.uniform(next(ks), (1, d), jnp.float32, -dw_bound, dw_bound)

    # BatchNorm1d (eval): gamma=1, beta=0, running_mean=0, running_var=1.
    eps = 1e-5
    bn_scale = jnp.full((1, d), 1.0 / (1.0 + eps) ** 0.5, jnp.float32)
    bn_shift = jnp.zeros((1, d), jnp.float32)
    bn1s, bn1b = bn_scale, bn_shift
    bn2s, bn2b = bn_scale, bn_shift

    wpw = lin_w(d, d)                                 # 1x1 Conv1d (no bias)

    w1, b1 = lin_w(d, 2 * d), lin_b(d, 2 * d)         # LightFNN layer 1
    w2, b2 = lin_w(2 * d, d), lin_b(2 * d, d)         # LightFNN layer 2

    wv, bv = lin_w(d, d), lin_b(d, d)                 # MHSA V projection
    wo, bo = lin_w(d, d), lin_b(d, d)                 # MHSA out_proj

    wup = lin_w(d, c_in)                              # up_proj (no bias)
    wld = lin_w(c_in, rank)                           # lora_down (no bias)
    wlu = lin_w(rank, c_in)                           # lora_up (no bias)

    return [gamma, beta, wdown, wgate, dw, bn1s, bn1b, wpw, bn2s, bn2b,
            w1, b1, w2, b2, wv, bv, wo, bo, wup, wld, wlu]


def fuse_params(raw, *, pack=None, matmul_dtype=jnp.bfloat16):
    """Offline algebraic folding (eval mode) + lane-dense sample packing.

    Returns (vec_pack, mmat, wdg_packed, w1f_packed, w2f_packed) where P
    samples share one 128-lane row and every weight is block-diagonally
    duplicated so the kernel's matmuls act on the packed layout directly.
    """
    (gamma, beta, wdown, wgate, dw, bn1s, bn1b, wpw, bn2s, bn2b,
     w1, b1, w2, b2, wv, bv, wo, bo, wup, wld, wlu) = raw
    d = wpw.shape[0]
    C = wup.shape[1]
    two_d = w1.shape[1]

    # (1) dw centre tap & BN1 scale fold into wpw rows; BN1 shift becomes a
    #     bias through wpw; BN2 folds into wpw columns; then fuse with FNN-1.
    A = (dw * bn1s).reshape(d, 1) * wpw                       # (d, d)
    c = bn1b @ wpw                                            # (1, d)
    A2 = A * bn2s                                             # (d, d)
    c2 = c * bn2s + bn2b                                      # (1, d)
    w1f = A2 @ w1                                             # (d, 2d)
    b1f = c2 @ w1 + b1                                        # (1, 2d)

    # (2) FNN-2 -> (V proj @ out_proj) -> up_proj(+LoRA), * residual_ratio 0.6.
    w_vo = wv @ wo                                            # (d, d)
    b_vo = bv @ wo + bo                                       # (1, d)
    w_a = w2 @ w_vo                                           # (2d, d)
    b_a = b2 @ w_vo + b_vo                                    # (1, d)
    w_up_eff = wup + wup @ (wld @ wlu)                        # (d, C)
    w2f = 0.6 * (w_a @ w_up_eff)                              # (2d, C)
    b2f = 0.6 * (b_a @ w_up_eff)                              # (1, C)

    # (3) Lane-dense packing: P samples per 128-lane row.
    if pack is None:
        pack = 128 // C if (0 < C <= 128 and 128 % C == 0) else 1
    P = max(1, pack)

    def bdiag(w):
        a, b = w.shape
        out = jnp.zeros((P * a, P * b), w.dtype)
        for k in range(P):
            out = out.at[k * a:(k + 1) * a, k * b:(k + 1) * b].set(w)
        return out

    # Column layout of the gate matmul: [down_0..down_{P-1} | gate_0..gate_{P-1}]
    # so the gate multiply splits at an aligned P*d lane offset.
    wdg_p = jnp.concatenate([bdiag(wdown), bdiag(wgate)], axis=1)  # (P*C, 2*P*d)
    w1f_p = bdiag(w1f)                                             # (P*d, P*2d)
    w2f_p = bdiag(w2f)                                             # (P*2d, P*C)
    # Per-sample averaging matrix (1/C in each sample's diagonal block).
    mmat = bdiag(jnp.full((C, C), 1.0 / C, jnp.float32))           # (P*C, P*C)

    # Lane-duplicated per-channel vectors, packed into one (8, width) operand.
    tile = lambda v: jnp.tile(v, (1, P))
    gamma_d, beta_d = tile(gamma), tile(beta)
    b1f_d, b2f_d = tile(b1f), tile(b2f)
    width = max(P * C, P * two_d)
    pad_row = lambda v: jnp.pad(v, ((0, 0), (0, width - v.shape[1])))
    rows = [pad_row(gamma_d), pad_row(beta_d), pad_row(b2f_d), pad_row(b1f_d)]
    vec_pack = jnp.concatenate(
        rows + [jnp.zeros((8 - len(rows), width), jnp.float32)], axis=0
    ).astype(jnp.float32)

    # NOTE: keep w2f_p in f32 instead if a tolerance tighter than ~1e-2 on the
    # nonlinear branch is ever required.
    return (vec_pack,
            mmat.astype(matmul_dtype),
            wdg_p.astype(matmul_dtype),
            w1f_p.astype(matmul_dtype),
            w2f_p.astype(matmul_dtype))


def adaptive_decision_ref(x, raw):
    """Pure-JAX, unfused f32 reference (eval-mode semantics, exact-erf GELU)."""
    (gamma, beta, wdown, wgate, dw, bn1s, bn1b, wpw, bn2s, bn2b,
     w1, b1, w2, b2, wv, bv, wo, bo, wup, wld, wlu) = raw
    residual = x
    mean = jnp.mean(x, -1, keepdims=True)
    var = jnp.mean(jnp.square(x - mean), -1, keepdims=True)
    xn = (x - mean) / jnp.sqrt(var + 1e-5) * gamma + beta
    h = (xn @ wdown) * jax.nn.sigmoid(xn @ wgate)
    h = h * dw
    h = h * bn1s + bn1b
    h = h @ wpw
    h = h * bn2s + bn2b
    f = _gelu_exact(h @ w1 + b1)
    h = f @ w2 + b2
    v = h @ wv + bv
    h = v @ wo + bo
    u = h @ wup
    u = u + (u @ wld) @ wlu
    return 0.6 * u + 0.4 * residual


if __name__ == "__main__":
    key = jax.random.PRNGKey(0)
    kx, kp = jax.random.split(key)

    B, c_in, reduction, rank = 16, 64, 4, 16
    x = jax.random.normal(kx, (B, c_in), jnp.float32)
    raw = init_params(kp, c_in=c_in, reduction=reduction, rank=rank)
    fused = fuse_params(raw, matmul_dtype=jnp.bfloat16)

    out = jax.block_until_ready(adaptive_decision(x, fused))
    assert out.shape == (B, c_in) and out.dtype == x.dtype
    assert bool(jnp.all(jnp.isfinite(out)))

    ref = adaptive_decision_ref(x, raw)
    assert bool(jnp.allclose(out, ref, atol=5e-2, rtol=5e-2)), float(
        jnp.max(jnp.abs(out - ref)))

    # Odd batch exercises the pad / reshape / slice path.
    x2 = jax.random.normal(jax.random.PRNGKey(3), (13, c_in), jnp.float32)
    out2 = jax.block_until_ready(adaptive_decision(x2, fused))
    ref2 = adaptive_decision_ref(x2, raw)
    assert out2.shape == (13, c_in)
    assert bool(jnp.allclose(out2, ref2, atol=5e-2, rtol=5e-2)), float(
        jnp.max(jnp.abs(out2 - ref2)))

    print("KERNEL_OK")
</pallas_src>

<mosaic_0001>
module attributes {stable_mosaic.version = 11 : i64} {
  func.func @adaptive_decision_kernel(%arg0: i32, %arg1: memref<8x128xf32, #tpu.memory_space<vmem>>, %arg2: memref<8x128xf32, #tpu.memory_space<vmem>>, %arg3: memref<128x128xbf16, #tpu.memory_space<vmem>>, %arg4: memref<128x64xbf16, #tpu.memory_space<vmem>>, %arg5: memref<32x64xbf16, #tpu.memory_space<vmem>>, %arg6: memref<64x128xbf16, #tpu.memory_space<vmem>>, %arg7: memref<8x128xf32, #tpu.memory_space<vmem>>) attributes {dimension_semantics = [#tpu.dimension_semantics<parallel>], iteration_bounds = array<i64: 1>, scalar_prefetch = 0 : i64, scratch_operands = 0 : i64, tpu.core_type = #tpu.core_type<tc>, window_params = [{transform_indices = @transform_0, window_bounds = array<i64: 8, 128>}, {pipeline_mode = #tpu.pipeline_mode<synchronous>, transform_indices = @transform_1, window_bounds = array<i64: 8, 128>}, {pipeline_mode = #tpu.pipeline_mode<synchronous>, transform_indices = @transform_2, window_bounds = array<i64: 128, 128>}, {pipeline_mode = #tpu.pipeline_mode<synchronous>, transform_indices = @transform_3, window_bounds = array<i64: 128, 64>}, {pipeline_mode = #tpu.pipeline_mode<synchronous>, transform_indices = @transform_4, window_bounds = array<i64: 32, 64>}, {pipeline_mode = #tpu.pipeline_mode<synchronous>, transform_indices = @transform_5, window_bounds = array<i64: 64, 128>}, {transform_indices = @transform_6, window_bounds = array<i64: 8, 128>}]} {
    %c0 = arith.constant 0 : index
    %c0_0 = arith.constant 0 : index
    %0 = vector.load %arg1[%c0, %c0_0] : memref<8x128xf32, #tpu.memory_space<vmem>>, vector<8x128xf32>
    %c0_1 = arith.constant 0 : index
    %c0_2 = arith.constant 0 : index
    %1 = vector.load %arg2[%c0_1, %c0_2] : memref<8x128xf32, #tpu.memory_space<vmem>>, vector<8x128xf32>
    %2 = vector.extract_strided_slice %1 {offsets = [0, 0], sizes = [1, 128], strides = [1, 1]} : vector<8x128xf32> to vector<1x128xf32>
    %3 = vector.extract_strided_slice %1 {offsets = [1, 0], sizes = [1, 128], strides = [1, 1]} : vector<8x128xf32> to vector<1x128xf32>
    %4 = vector.extract_strided_slice %1 {offsets = [2, 0], sizes = [1, 128], strides = [1, 1]} : vector<8x128xf32> to vector<1x128xf32>
    %5 = vector.extract_strided_slice %1 {offsets = [3, 0], sizes = [1, 64], strides = [1, 1]} : vector<8x128xf32> to vector<1x64xf32>
    %6 = arith.truncf %0 : vector<8x128xf32> to vector<8x128xbf16>
    %c0_3 = arith.constant 0 : index
    %c0_4 = arith.constant 0 : index
    %7 = vector.load %arg3[%c0_3, %c0_4] : memref<128x128xbf16, #tpu.memory_space<vmem>>, vector<128x128xbf16>
    %cst = arith.constant dense<0.000000e+00> : vector<8x128xf32>
    %8 = tpu.matmul %6, %7, %cst {dimension_numbers = #tpu.dot_dimension_numbers<[1], [0], [0], [1], [0, 0, 1, 1], [], []>} : vector<8x128xbf16>, vector<128x128xbf16>, vector<8x128xf32> -> vector<8x128xf32>
    %9 = arith.mulf %0, %0 : vector<8x128xf32>
    %10 = arith.truncf %9 : vector<8x128xf32> to vector<8x128xbf16>
    %c0_5 = arith.constant 0 : index
    %c0_6 = arith.constant 0 : index
    %11 = vector.load %arg3[%c0_5, %c0_6] : memref<128x128xbf16, #tpu.memory_space<vmem>>, vector<128x128xbf16>
    %cst_7 = arith.constant dense<0.000000e+00> : vector<8x128xf32>
    %12 = tpu.matmul %10, %11, %cst_7 {dimension_numbers = #tpu.dot_dimension_numbers<[1], [0], [0], [1], [0, 0, 1, 1], [], []>} : vector<8x128xbf16>, vector<128x128xbf16>, vector<8x128xf32> -> vector<8x128xf32>
    %13 = arith.mulf %8, %8 : vector<8x128xf32>
    %14 = arith.subf %12, %13 : vector<8x128xf32>
    %cst_8 = arith.constant 0.000000e+00 : f32
    %15 = vector.broadcast %cst_8 : f32 to vector<8x128xf32>
    %16 = arith.maximumf %14, %15 : vector<8x128xf32>
    %17 = arith.subf %0, %8 : vector<8x128xf32>
    %cst_9 = arith.constant 9.99999974E-6 : f32
    %18 = vector.broadcast %cst_9 : f32 to vector<8x128xf32>
    %19 = arith.addf %16, %18 : vector<8x128xf32>
    %20 = math.rsqrt %19 : vector<8x128xf32>
    %21 = arith.mulf %17, %20 : vector<8x128xf32>
    %22 = vector.broadcast %2 : vector<1x128xf32> to vector<8x128xf32>
    %23 = arith.mulf %21, %22 : vector<8x128xf32>
    %24 = vector.broadcast %3 : vector<1x128xf32> to vector<8x128xf32>
    %25 = arith.addf %23, %24 : vector<8x128xf32>
    %26 = arith.truncf %25 : vector<8x128xf32> to vector<8x128xbf16>
    %c0_10 = arith.constant 0 : index
    %c0_11 = arith.constant 0 : index
    %27 = vector.load %arg4[%c0_10, %c0_11] : memref<128x64xbf16, #tpu.memory_space<vmem>>, vector<128x64xbf16>
    %cst_12 = arith.constant dense<0.000000e+00> : vector<8x64xf32>
    %28 = tpu.matmul %26, %27, %cst_12 {dimension_numbers = #tpu.dot_dimension_numbers<[1], [0], [0], [1], [0, 0, 1, 1], [], []>} : vector<8x128xbf16>, vector<128x64xbf16>, vector<8x64xf32> -> vector<8x64xf32>
    %29 = vector.extract_strided_slice %28 {offsets = [0, 0], sizes = [8, 32], strides = [1, 1]} : vector<8x64xf32> to vector<8x32xf32>
    %30 = vector.extract_strided_slice %28 {offsets = [0, 32], sizes = [8, 32], strides = [1, 1]} : vector<8x64xf32> to vector<8x32xf32>
    %31 = arith.negf %30 : vector<8x32xf32>
    %32 = math.exp %31 : vector<8x32xf32>
    %cst_13 = arith.constant 1.000000e+00 : f32
    %33 = vector.broadcast %cst_13 : f32 to vector<8x32xf32>
    %34 = arith.addf %33, %32 : vector<8x32xf32>
    %35 = arith.divf %33, %34 : vector<8x32xf32>
    %36 = arith.mulf %29, %35 : vector<8x32xf32>
    %37 = arith.truncf %36 : vector<8x32xf32> to vector<8x32xbf16>
    %c0_14 = arith.constant 0 : index
    %c0_15 = arith.constant 0 : index
    %38 = vector.load %arg5[%c0_14, %c0_15] : memref<32x64xbf16, #tpu.memory_space<vmem>>, vector<32x64xbf16>
    %cst_16 = arith.constant dense<0.000000e+00> : vector<8x64xf32>
    %39 = tpu.matmul %37, %38, %cst_16 {dimension_numbers = #tpu.dot_dimension_numbers<[1], [0], [0], [1], [0, 0, 1, 1], [], []>} : vector<8x32xbf16>, vector<32x64xbf16>, vector<8x64xf32> -> vector<8x64xf32>
    %40 = vector.broadcast %5 : vector<1x64xf32> to vector<8x64xf32>
    %41 = arith.addf %39, %40 : vector<8x64xf32>
    %42 = arith.mulf %41, %41 : vector<8x64xf32>
    %43 = arith.mulf %41, %42 : vector<8x64xf32>
    %cst_17 = arith.constant 4.471500e-02 : f32
    %44 = vector.broadcast %cst_17 : f32 to vector<8x64xf32>
    %45 = arith.mulf %44, %43 : vector<8x64xf32>
    %46 = arith.addf %41, %45 : vector<8x64xf32>
    %cst_18 = arith.constant 0.797884583 : f32
    %47 = vector.broadcast %cst_18 : f32 to vector<8x64xf32>
    %48 = arith.mulf %47, %46 : vector<8x64xf32>
    %49 = math.tanh %48 : vector<8x64xf32>
    %cst_19 = arith.constant 1.000000e+00 : f32
    %50 = vector.broadcast %cst_19 : f32 to vector<8x64xf32>
    %51 = arith.addf %50, %49 : vector<8x64xf32>
    %cst_20 = arith.constant 5.000000e-01 : f32
    %52 = vector.broadcast %cst_20 : f32 to vector<8x64xf32>
    %53 = arith.mulf %52, %51 : vector<8x64xf32>
    %54 = arith.mulf %41, %53 : vector<8x64xf32>
    %55 = arith.truncf %54 : vector<8x64xf32> to vector<8x64xbf16>
    %c0_21 = arith.constant 0 : index
    %c0_22 = arith.constant 0 : index
    %56 = vector.load %arg6[%c0_21, %c0_22] : memref<64x128xbf16, #tpu.memory_space<vmem>>, vector<64x128xbf16>
    %cst_23 = arith.constant dense<0.000000e+00> : vector<8x128xf32>
    %57 = tpu.matmul %55, %56, %cst_23 {dimension_numbers = #tpu.dot_dimension_numbers<[1], [0], [0], [1], [0, 0, 1, 1], [], []>} : vector<8x64xbf16>, vector<64x128xbf16>, vector<8x128xf32> -> vector<8x128xf32>
    %58 = vector.broadcast %4 : vector<1x128xf32> to vector<8x128xf32>
    %59 = arith.addf %57, %58 : vector<8x128xf32>
    %cst_24 = arith.constant 4.000000e-01 : f32
    %60 = vector.broadcast %cst_24 : f32 to vector<8x128xf32>
    %61 = arith.mulf %60, %0 : vector<8x128xf32>
    %62 = arith.addf %59, %61 : vector<8x128xf32>
    %c0_25 = arith.constant 0 : index
    %c0_26 = arith.constant 0 : index
    %63 = vector.load %arg7[%c0_25, %c0_26] : memref<8x128xf32, #tpu.memory_space<vmem>>, vector<8x128xf32>
    tpu.vector_store %arg7[%c0_25, %c0_26], %62 {strides = array<i32>} : memref<8x128xf32, #tpu.memory_space<vmem>>, vector<8x128xf32>,
    return
  }
  func.func @transform_0(%arg0: i32) -> (i32, i32) {
    %c0_i32 = arith.constant 0 : i32
    %c0_i32_0 = arith.constant 0 : i32
    return %arg0, %c0_i32 : i32, i32
  }
  func.func @transform_1(%arg0: i32) -> (i32, i32) {
    %c0_i32 = arith.constant 0 : i32
    %c0_i32_0 = arith.constant 0 : i32
    %c0_i32_1 = arith.constant 0 : i32
    return %c0_i32, %c0_i32_0 : i32, i32
  }
  func.func @transform_2(%arg0: i32) -> (i32, i32) {
    %c0_i32 = arith.constant 0 : i32
    %c0_i32_0 = arith.constant 0 : i32
    %c0_i32_1 = arith.constant 0 : i32
    return %c0_i32, %c0_i32_0 : i32, i32
  }
  func.func @transform_3(%arg0: i32) -> (i32, i32) {
    %c0_i32 = arith.constant 0 : i32
    %c0_i32_0 = arith.constant 0 : i32
    %c0_i32_1 = arith.constant 0 : i32
    return %c0_i32, %c0_i32_0 : i32, i32
  }
  func.func @transform_4(%arg0: i32) -> (i32, i32) {
    %c0_i32 = arith.constant 0 : i32
    %c0_i32_0 = arith.constant 0 : i32
    %c0_i32_1 = arith.constant 0 : i32
    return %c0_i32, %c0_i32_0 : i32, i32
  }
  func.func @transform_5(%arg0: i32) -> (i32, i32) {
    %c0_i32 = arith.constant 0 : i32
    %c0_i32_0 = arith.constant 0 : i32
    %c0_i32_1 = arith.constant 0 : i32
    return %c0_i32, %c0_i32_0 : i32, i32
  }
  func.func @transform_6(%arg0: i32) -> (i32, i32) {
    %c0_i32 = arith.constant 0 : i32
    %c0_i32_0 = arith.constant 0 : i32
    return %arg0, %c0_i32 : i32, i32
  }
}

</mosaic_0001>

<bundles_post_ra>
// kernel: tpu_custom_call.1
= control target key start
LH: loop header
LB: loop body
LE: loop exit
PB: predicated region body
PF: predicated region fallthrough
CT: control target
= control target key end

     0   :  { %11 = vsyncpa [#allocation3], 0  ;;  %s1003_s0 = inlined_call_operand.hbm [shape: f32[8,128], index: 0, kind: input, shape index: {}]   ;;  %s1004_s1 = inlined_call_operand.hbm [shape: f32[8,128], index: 1, kind: input, shape index: {}]   ;;  %s1005_s2 = inlined_call_operand.vmem [shape: bf16[128,128], index: 2, kind: input, shape index: {}]   ;;  %s1006_s3 = inlined_call_operand.vmem [shape: bf16[128,64], index: 3, kind: input, shape index: {}]   ;;  %s1007_s4 = inlined_call_operand.hbm [shape: bf16[32,64], index: 4, kind: input, shape index: {}]   ;;  %s1008_s5 = inlined_call_operand.vmem [shape: bf16[64,128], index: 5, kind: input, shape index: {}]   ;;  %s1009_s6 = inlined_call_operand.hbm [shape: f32[8,128], index: 6, kind: output, shape index: {}]  }
   0x1   :  { %12 = vsyncpa [#allocation6], 0 }
   0x2   :  { %13 = vsyncpa [#allocation4], 0  ;;  %s791_s21 = smov [#allocation5]   ;;  %s792_s23 = smov [#allocation2]  }
   0x3   :  { %s30_s22 = sshll.u32 %s791_s21, 4  ;;  %s20_s24 = sshll.u32 %s792_s23, 4  ;;  %s31_s22 = int_to_ptr.vmem [resolvable:$true] %s30_s22  ;;  %s21_s24 = int_to_ptr.vmem [resolvable:$true] %s20_s24 }
   0x4   :  { %s697_s27 = scalar_lea.hbm %s1004_s1, 128 }
   0x5   :  { %p698_p0 = scmp.ne.s32.totalorder %s1004_s1, %s697_s27  ;;  %p701_p1 = scmp.lt.u32.totalorder %s697_s27, %s1004_s1 }
   0x7   :  { %p703_p2 = pnand %p701_p1, %p698_p0 }
   0x9   :  { %706 = shalt.err (!%p703_p2)
}
   0xa   :  { %s707_s8 = scalar_lea.vmem %s31_s22, 128  ;;  %p712_p4 = scmp.lt.s32.totalorder %s31_s22, %s31_s22 }
   0xb   :  { %p708_p3 = scmp.ne.s32.totalorder %s31_s22, %s707_s8  ;;  %p713_p5 = scmp.lt.s32.totalorder %s707_s8, %s707_s8 }
   0xd   :  { %p714_p6 = por %p713_p5, %p712_p4 }
   0xf   :  { %p715_p7 = pnand %p714_p6, %p708_p3 }
  0x11   :  { %718 = shalt.err (!%p715_p7)
}
  0x12   :  { %33 = dma.hbm_to_vmem [thread:$0]  %s1004_s1, 128, %s31_s22, [#allocation6]  }
  0x13   :  { %s719_s13 = scalar_lea.hbm %s1003_s0, 128 }
  0x14   :  { %p720_p8 = scmp.ne.s32.totalorder %s1003_s0, %s719_s13  ;;  %p723_p9 = scmp.lt.u32.totalorder %s719_s13, %s1003_s0 }
  0x16   :  { %p725_p10 = pnand %p723_p9, %p720_p8 }
  0x18   :  { %728 = shalt.err (!%p725_p10)
}
  0x19   :  { %s729_s18 = scalar_lea.vmem %s21_s24, 128  ;;  %p734_p12 = scmp.lt.s32.totalorder %s21_s24, %s21_s24 }
  0x1a   :  { %p730_p11 = scmp.ne.s32.totalorder %s21_s24, %s729_s18  ;;  %p735_p13 = scmp.lt.s32.totalorder %s729_s18, %s729_s18 }
  0x1c   :  { %p736_p0 = por %p735_p13, %p734_p12 }
  0x1e   :  { %p737_p1 = pnand %p736_p0, %p730_p11 }
  0x20   :  { %740 = shalt.err (!%p737_p1)
}
  0x21   :  { %23 = dma.hbm_to_vmem [thread:$0]  %s1003_s0, 128, %s21_s24, [#allocation3]  }
  0x22   :  { %s793_s20 = smov [#allocation7]   ;;  %s741_s25 = scalar_lea.hbm %s1007_s4, 256 }
  0x23   :  { %s43_s21 = sshll.u32 %s793_s20, 4  ;;  %p742_p2 = scmp.ne.s32.totalorder %s1007_s4, %s741_s25  ;;  %s44_s21 = int_to_ptr.vmem [resolvable:$true] %s43_s21 }
  0x24   :  { %p745_p3 = scmp.lt.u32.totalorder %s741_s25, %s1007_s4 }
  0x26   :  { %p747_p4 = pnand %p745_p3, %p742_p2 }
  0x28   :  { %750 = shalt.err (!%p747_p4)
}
  0x29   :  { %s751_s30 = scalar_lea.vmem %s44_s21, 256  ;;  %p756_p6 = scmp.lt.s32.totalorder %s44_s21, %s44_s21 }
  0x2a   :  { %p752_p5 = scmp.ne.s32.totalorder %s44_s21, %s751_s30  ;;  %p757_p7 = scmp.lt.s32.totalorder %s751_s30, %s751_s30 }
  0x2c   :  { %p758_p8 = por %p757_p7, %p756_p6 }
  0x2e   :  { %p759_p9 = pnand %p758_p8, %p752_p5 }
  0x30   :  { %762 = shalt.err (!%p759_p9)
}
  0x31   :  { %s794_s0 = smov 64   ;;  %s795_s24 = smov 4  }
  0x32   :  { %49 = dma.hbm_to_vmem [thread:$0]  %s1007_s4, 256, %s44_s21, [#allocation6], %s794_s0, %s794_s0, %s795_s24  }
  0x33   :  { %785 = dma.done.wait [#allocation3], 128  }
  0x34   :  { %786 = vsyncadd [#allocation3], 4294967168 }
  0x35   :  { %787 = dma.done.wait [#allocation6], 384  }
  0x36   :  { %788 = vsyncadd [#allocation6], 4294966912  ;;  %v796_v0 = vmov 0.0   ;;  %vm797_vm0 = vmmov 0   ;;  %v667_v1 = vld [vmem:[%s1005_s2] sm:$0xff]   ;;  %v668_v2 = vld [vmem:[%s1005_s2 + $0x8] sm:$0xff]   ;;  %v218_v32 = vlaneseq }
  0x37   :  { %578 = vmatprep.subr.bf16.mxu0 %v796_v0  ;;  %598 = vmatprep.subr.bf16.mxu1 %v796_v0  ;;  %v669_v3 = vld [vmem:[%s1005_s2 + $0x10] sm:$0xff]   ;;  %v670_v4 = vld [vmem:[%s1005_s2 + $0x18] sm:$0xff]   ;;  %v671_v5 = vld [vmem:[%s1005_s2 + $0x20] sm:$0xff]   ;;  %vm365_vm1 = vcmask 261120   ;;  %vm455_vm2 = vcmask 523264  }
  0x38   :  { %594 = vmatprep.mubr.msk.bf16.mxu0 %vm797_vm0, %v796_v0  ;;  %614 = vmatprep.mubr.msk.bf16.mxu1 %vm797_vm0, %v796_v0  ;;  %v672_v6 = vld [vmem:[%s1005_s2 + $0x28] sm:$0xff]   ;;  %v673_v7 = vld [vmem:[%s1005_s2 + $0x30] sm:$0xff]   ;;  %v908_v8 = vld [vmem:[#allocation2] sm:$0xff]  ;;  %v958_v34 = vshrl.u32 %v218_v32, 7 }
  0x39   :  { %579 = vmatpush3.bf16.msra.mxu0 %v667_v1  ;;  %599 = vmatpush3.bf16.msra.mxu1 %v667_v1  ;;  %v169_v9 = vmul.f32 %v908_v8, %v908_v8  ;;  %v674_v10 = vld [vmem:[%s1005_s2 + $0x38] sm:$0xff]   ;;  %v64_v11 = vpack.c.bf16 %v908_v8, %v908_v8  ;;  %v675_v13 = vld [vmem:[%s1006_s3] sm:$0xff]   ;;  %v676_v14 = vld [vmem:[%s1006_s3 + $0x8] sm:$0xff]  }
  0x3a   :  { %580 = vmatprep.subr.bf16.mxu0 %v796_v0  ;;  %600 = vmatprep.subr.bf16.mxu1 %v796_v0  ;;  %v677_v15 = vld [vmem:[%s1006_s3 + $0x10] sm:$0xff]   ;;  %v678_v16 = vld [vmem:[%s1006_s3 + $0x18] sm:$0xff]   ;;  %v679_v17 = vld [vmem:[%s1006_s3 + $0x20] sm:$0xff]   ;;  %v220_v35 = vsub.s32 0, %v958_v34  ;;  %v225_v37 = vsub.s32 1, %v958_v34  ;;  %v351_v63 = vsub.s32 3, %v958_v34 }
  0x3b   :  { %v170_v12 = vpack.c.bf16 %v169_v9, %v169_v9  ;;  %v680_v18 = vld [vmem:[%s1006_s3 + $0x28] sm:$0xff]   ;;  %v681_v19 = vld [vmem:[%s1006_s3 + $0x30] sm:$0xff]   ;;  %v682_v20 = vld [vmem:[%s1006_s3 + $0x38] sm:$0xff]   ;;  %s798_s3 = smov 96  }
  0x3c   :  { %v961_v36 = vld [vmem:[#allocation5] sm:$0xff]  ;;  %v683_v46 = vld [vmem:[#allocation7] sm:$0xff]   ;;  %v684_v53 = vld [vmem:[#allocation7 + $0x8] sm:$0xff]  }
  0x3d   :  { %581 = vmatpush3.bf16.msra.mxu0 %v668_v2  ;;  %601 = vmatpush3.bf16.msra.mxu1 %v668_v2  ;;  %v221_v39 = vrot.slane %v961_v36, %v220_v35  ;;  %v226_v42 = vrot.slane %v961_v36, %v225_v37  ;;  %v685_v59 = vld [vmem:[%s1008_s5] sm:$0xff]   ;;  %v686_v60 = vld [vmem:[%s1008_s5 + $0x8] sm:$0xff]   ;;  %v687_v61 = vld [vmem:[%s1008_s5 + $0x10] sm:$0xff]   ;;  %v352_v1 = vrot.slane %v961_v36, %v351_v63 }
  0x3e   :  { %582 = vmatprep.subr.bf16.mxu0 %v796_v0  ;;  %602 = vmatprep.subr.bf16.mxu1 %v796_v0  ;;  %v688_v62 = vld [vmem:[%s1008_s5 + $0x18] sm:$0xff]   ;;  %s799_s5 = smov [#allocation8]  }
  0x3f   :  { %s508_s19 = sshll.u32 %s799_s5, 4  ;;  %s509_s19 = int_to_ptr.vmem [resolvable:$true] %s508_s19 }
  0x40   :  { %s763_s20 = scalar_lea.vmem %s509_s19, 128  ;;  %p768_p11 = scmp.lt.s32.totalorder %s509_s19, %s509_s19 }
  0x41   :  { %583 = vmatpush3.bf16.msra.mxu0 %v669_v3  ;;  %603 = vmatpush3.bf16.msra.mxu1 %v669_v3  ;;  %p764_p10 = scmp.ne.s32.totalorder %s509_s19, %s763_s20  ;;  %p769_p12 = scmp.lt.s32.totalorder %s763_s20, %s763_s20 }
  0x42   :  { %584 = vmatprep.subr.bf16.mxu0 %v796_v0  ;;  %604 = vmatprep.subr.bf16.mxu1 %v796_v0 }
  0x43   :  { %p770_p13 = por %p769_p12, %p768_p11 }
  0x45   :  { %585 = vmatpush3.bf16.msra.mxu0 %v670_v4  ;;  %605 = vmatpush3.bf16.msra.mxu1 %v670_v4  ;;  %p771_p0 = pnand %p770_p13, %p764_p10 }
  0x46   :  { %586 = vmatprep.subr.bf16.mxu0 %v796_v0  ;;  %606 = vmatprep.subr.bf16.mxu1 %v796_v0 }
  0x49   :  { %587 = vmatpush3.bf16.msra.mxu0 %v671_v5  ;;  %607 = vmatpush3.bf16.msra.mxu1 %v671_v5 }
  0x4a   :  { %588 = vmatprep.subr.bf16.mxu0 %v796_v0  ;;  %608 = vmatprep.subr.bf16.mxu1 %v796_v0 }
  0x4d   :  { %589 = vmatpush3.bf16.msra.mxu0 %v672_v6  ;;  %609 = vmatpush3.bf16.msra.mxu1 %v672_v6 }
  0x4e   :  { %590 = vmatprep.subr.bf16.mxu0 %v796_v0  ;;  %610 = vmatprep.subr.bf16.mxu1 %v796_v0 }
  0x51   :  { %591 = vmatpush3.bf16.msra.mxu0 %v673_v7  ;;  %611 = vmatpush3.bf16.msra.mxu1 %v673_v7 }
  0x52   :  { %592 = vmatprep.subr.bf16.mxu0 %v796_v0  ;;  %612 = vmatprep.subr.bf16.mxu1 %v796_v0 }
  0x55   :  { %593 = vmatpush3.bf16.msra.mxu0 %v674_v10  ;;  %613 = vmatpush3.bf16.msra.mxu1 %v674_v10 }
  0x56   :  { %618 = vmatprep.subr.bf16.mxu0 %v796_v0  ;;  %638 = vmatprep.subr.bf16.mxu1 %v796_v0 }
  0x58   :  { %595 = vmatmul.mubr.bf16.vlgmr.msra.gmra.mrb[0].mxu0 %v64_v11  ;;  %615 = vmatmul.mubr.bf16.vlgmr.msra.gmra.mrb[0].mxu1 %v170_v12 }
  0x59   :  { %619 = vmatpush3.bf16.msra.mxu0 %v675_v13  ;;  %634 = vmatprep.mubr.msk.bf16.mxu0 %vm797_vm0, %v796_v0 }
  0x5a   :  { %620 = vmatprep.subr.bf16.mxu0 %v796_v0  ;;  %642 = vmatprep.mubr.msk.bf16.mxu1 %vm797_vm0, %v796_v0 }
  0x5b   :  { %639 = vmatpush3.bf16.msra.mxu1 %v683_v46 }
  0x5c   :  { %640 = vmatprep.subr.bf16.mxu1 %v796_v0 }
  0x5d   :  { %621 = vmatpush3.bf16.msra.mxu0 %v676_v14 }
  0x5e   :  { %622 = vmatprep.subr.bf16.mxu0 %v796_v0 }
  0x5f   :  { %641 = vmatpush3.bf16.msra.mxu1 %v684_v53 }
  0x60   :  { %646 = vmatprep.subr.bf16.mxu1 %v796_v0 }
  0x61   :  { %623 = vmatpush3.bf16.msra.mxu0 %v677_v15 }
  0x62   :  { %624 = vmatprep.subr.bf16.mxu0 %v796_v0 }
  0x65   :  { %625 = vmatpush3.bf16.msra.mxu0 %v678_v16 }
  0x66   :  { %626 = vmatprep.subr.bf16.mxu0 %v796_v0 }
  0x69   :  { %627 = vmatpush3.bf16.msra.mxu0 %v679_v17  ;;  %v429_v17 = vsub.s32 2, %v958_v34 }
  0x6a   :  { %628 = vmatprep.subr.bf16.mxu0 %v796_v0 }
  0x6d   :  { %629 = vmatpush3.bf16.msra.mxu0 %v680_v18  ;;  %v430_v18 = vrot.slane %v961_v36, %v429_v17 }
  0x6e   :  { %630 = vmatprep.subr.bf16.mxu0 %v796_v0 }
  0x71   :  { %631 = vmatpush3.bf16.msra.mxu0 %v681_v19  ;;  %v499_v19 = vmul.f32 0.4, %v908_v8 }
  0x72   :  { %632 = vmatprep.subr.bf16.mxu0 %v796_v0 }
  0x75   :  { %633 = vmatpush3.bf16.msra.mxu0 %v682_v20 }
 0x12b   :  { %v163_v21 = vpop.f32.mrb[0].mxu0  ;;  %v205_v22 = vpop.f32.mrb[0].mxu1 }
 0x12c   :  { %v211_v23 = vmul.f32 %v163_v21, %v163_v21  ;;  %v596_v24 = vpop.f32.mrb[1].mxu0  ;;  %v616_v25 = vpop.f32.mrb[1].mxu1  ;;  %v214_v38 = vsub.f32 %v908_v8, %v163_v21 }
 0x12d   :  { %v166_v26 = vpop.f32.mrb[2].mxu0  ;;  %v208_v27 = vpop.f32.mrb[2].mxu1 }
 0x12e   :  { %v212_v28 = vsub.f32 %v205_v22, %v211_v23  ;;  %v597_v29 = vpop.f32.mrb[3].mxu0  ;;  %v617_v30 = vpop.f32.mrb[3].mxu1 }
 0x130   :  { %v213_v31 = vmax.f32 %v212_v28, 0.0 }
 0x132   :  { %v215_v33 = vadd.f32 1e-05, %v213_v31 }
 0x134   :  { %689 = vrsqrt.f32 %v215_v33 }
 0x13e   :  { %v690_v40 = vpop.eup %689 }
 0x13f   :  { %v217_v41 = vmul.f32 %v690_v40, %v214_v38 }
 0x141   :  { %v222_v43 = vmul.f32 %v221_v39, %v217_v41 }
 0x143   :  { %v227_v44 = vadd.f32 %v226_v42, %v222_v43 }
 0x145   :  { %v228_v45 = vpack.c.bf16 %v227_v44, %v227_v44 }
 0x147   :  { %635 = vmatmul.mubr.bf16.vlgmr.msra.gmra.mrb[4].mxu0 %v228_v45 }
 0x21a   :  { %v327_v47 = vpop.f32.mrb[4].mxu0 }
 0x21b   :  { %v534_v48 = vmul.f32 -1.442695, %v327_v47  ;;  %v636_v49 = vpop.f32.mrb[5].mxu0 }
 0x21c   :  { %v330_v50 = vpop.f32.mrb[6].mxu0 }
 0x21d   :  { %691 = vpow2.f32 %v534_v48  ;;  %v637_v51 = vpop.f32.mrb[7].mxu0 }
 0x227   :  { %v692_v52 = vpop.eup %691 }
 0x228   :  { %v336_v54 = vadd.f32 1.0, %v692_v52 }
 0x22a   :  { %693 = vrcp.f32 %v336_v54 }
 0x234   :  { %v694_v55 = vpop.eup %693 }
 0x235   :  { %340 = vrot.lane.b32.xlu0 %v694_v55, %s798_s3 }
 0x2a7   :  { %v341_v56 = vpop.permute.xlu0 %340 }
 0x2a8   :  { %v343_v57 = vmul.f32 %v341_v56, %v327_v47 }
 0x2aa   :  { %v344_v58 = vpack.c.bf16 %v343_v57, %v343_v57 }
 0x2ac   :  { %643 = vmatmul.mubr.msk.bf16.vlgmr.msra.gmra.mrb[4].mxu1 %vm365_vm1, %v344_v58 }
 0x2ad   :  { %654 = vmatprep.mubr.msk.bf16.mxu1 %vm797_vm0, %v796_v0  ;;  %647 = vmatpush3.bf16.msra.mxu1 %v685_v59 }
 0x2ae   :  { %648 = vmatprep.subr.bf16.mxu1 %v796_v0 }
 0x2b1   :  { %649 = vmatpush3.bf16.msra.mxu1 %v686_v60 }
 0x2b2   :  { %650 = vmatprep.subr.bf16.mxu1 %v796_v0 }
 0x2b5   :  { %651 = vmatpush3.bf16.msra.mxu1 %v687_v61 }
 0x2b6   :  { %652 = vmatprep.subr.bf16.mxu1 %v796_v0 }
 0x2b9   :  { %653 = vmatpush3.bf16.msra.mxu1 %v688_v62 }
 0x37f   :  { %v403_v2 = vpop.f32.mrb[4].mxu1 }
 0x380   :  { %v404_v3 = vadd.f32 %v403_v2, %v352_v1  ;;  %v644_v4 = vpop.f32.mrb[5].mxu1 }
 0x381   :  { %v406_v5 = vpop.f32.mrb[6].mxu1 }
 0x382   :  { %v409_v6 = vmul.f32 %v404_v3, %v404_v3  ;;  %v645_v7 = vpop.f32.mrb[7].mxu1 }
 0x384   :  { %v410_v9 = vmul.f32 %v409_v6, %v404_v3 }
 0x386   :  { %v411_v10 = vmul.f32 0.044715, %v410_v9 }
 0x388   :  { %v412_v11 = vadd.f32 %v411_v10, %v404_v3 }
 0x38a   :  { %v413_v12 = vmul.f32 0.7978846, %v412_v11 }
 0x38c   :  { %695 = vtanh.f32 %v413_v12 }
 0x396   :  { %v696_v0 = vpop.eup %695 }
 0x397   :  { %v415_v13 = vadd.f32 1.0, %v696_v0 }
 0x399   :  { %v416_v14 = vmul.f32 0.5, %v415_v13 }
 0x39b   :  { %v417_v15 = vmul.f32 %v416_v14, %v404_v3 }
 0x39d   :  { %v418_v16 = vpack.c.bf16 %v417_v15, %v417_v15 }
 0x39f   :  { %655 = vmatmul.mubr.msk.bf16.vlgmr.msra.gmra.mrb[8].mxu1 %vm455_vm2, %v418_v16 }
 0x472   :  { %v493_v20 = vpop.f32.mrb[8].mxu1 }
 0x473   :  { %v494_v21 = vadd.f32 %v493_v20, %v430_v18  ;;  %v656_v22 = vpop.f32.mrb[9].mxu1 }
 0x474   :  { %v496_v23 = vpop.f32.mrb[10].mxu1 }
 0x475   :  { %v500_v24 = vadd.f32 %v499_v19, %v494_v21  ;;  %v657_v25 = vpop.f32.mrb[11].mxu1 }
 0x477   :  { %501 = vst [vmem:[#allocation8] sm:$0xff] %v500_v24 }
 0x478   :  { %774 = shalt.err (!%p771_p0)
}
 0x479   :  { %s775_s23 = scalar_lea.hbm %s1009_s6, 128 }
 0x47a   :  { %p776_p1 = scmp.ne.s32.totalorder %s1009_s6, %s775_s23  ;;  %p779_p2 = scmp.lt.u32.totalorder %s775_s23, %s1009_s6 }
 0x47c   :  { %p781_p3 = pnand %p779_p2, %p776_p1 }
 0x47e   :  { %784 = shalt.err (!%p781_p3)
}
 0x47f   :  { %511 = dma.vmem_to_hbm [thread:$0]  %s509_s19, 128, %s1009_s6, [#allocation4]  }
 0x480   :  { %789 = dma.done.wait [#allocation4], 128  }
 0x481   :  { %790 = vsyncadd [#allocation4], 4294967168 }
 0x482   :  { %515 = vsyncpa [#allocation3], 1 }
 0x483   :  { %516 = vsyncpa [#allocation6], 1 }
 0x484   :  { %517 = vsyncpa [#allocation4], 1 }

</bundles_post_ra>
